<compile_context>
chip_gen: v6e
topology: v6e:2x2x1
jax: 0.10.0
libtpu: 0.0.40
codegen_flags: <defaults>
</compile_context>

<pallas_src>
import functools

import jax
import jax.numpy as jnp
from jax.experimental import pallas as pl
from jax.experimental.pallas import tpu as pltpu

_LANE = 128
_SUBLANE = 8
_F32 = 4
_TARGET_TILE_BYTES = 2 * 1024 * 1024   # ~2 MiB input tiles: >=85% of HBM roofline


def _round_up(x, m):
    return (x + m - 1) // m * m


def _vmem_budget_bytes():
    """Conservative VMEM budget for tile selection + explicit compiler limit."""
    try:
        info = pltpu.get_tpu_info()
        physical = int(getattr(info, "vmem_capacity_bytes", 64 * 1024 * 1024))
    except Exception:                      # be robust if the query is unavailable
        physical = 64 * 1024 * 1024        # v7x per-core VMEM (the smallest case)
    vmem_limit = min(int(physical * 0.75), 96 * 1024 * 1024)
    budget = int(vmem_limit * 0.6)         # headroom for compiler temporaries
    return budget, vmem_limit


def _choose_tiles(n_rows, n_cols, in_itemsize, budget):
    """Pick (block_rows, block_cols) from the VMEM budget / roofline target."""
    # lane-padded (rows, 1) buffers: targets (x2 bufs), 2 outputs (x2 bufs), 4 scratch
    row_overhead = _LANE * _F32 * 10
    # per row with the full class dim resident: double-buffered input + ~4 f32 temps
    per_row_full = n_cols * (2 * in_itemsize + 4 * _F32) + row_overhead
    max_rows_full = budget // per_row_full
    if max_rows_full >= _SUBLANE:
        tc = n_cols                                      # single class block
        tm = max(_TARGET_TILE_BYTES // max(n_cols * in_itemsize, 1), _SUBLANE)
        tm = min(tm, max_rows_full)
    else:
        # class dim too wide for VMEM: tile it (online logsumexp), keep 8 rows
        tm = _SUBLANE
        per_lane = _SUBLANE * (2 * in_itemsize + 4 * _F32)
        tc = (budget - _SUBLANE * row_overhead) // per_lane
        tc = max((tc // _LANE) * _LANE, _LANE)
        tc = min(tc, _round_up(n_cols, _LANE))
    # rows: multiple of 8, or the full (possibly ragged) batch
    if tm >= n_rows:
        tm = n_rows
    else:
        tm = max((tm // _SUBLANE) * _SUBLANE, _SUBLANE)
    # v7x has two TensorCores; give the "parallel" row axis >= 2 steps when possible
    if n_rows >= 2 * _SUBLANE and pl.cdiv(n_rows, tm) < 2:
        tm = _round_up(pl.cdiv(n_rows, 2), _SUBLANE)
    return int(tm), int(tc)


def _lsce_kernel(x_ref, t_ref, nll_ref, smooth_ref,
                 m_acc, se_acc, sx_acc, pk_acc, *, num_classes, mask_cols):
    """Online log-softmax stats for one (TM, TC) tile of logits.

    Accumulates (per row): running max, running sum(exp), running sum(x) and the
    target logit, across the class-block grid axis; finalizes per-row NLL and
    the smoothing term (-sum_j log_softmax_j) on the last class block.
    """
    j = pl.program_id(1)

    @pl.when(j == 0)
    def _init():
        m_acc[...] = jnp.full(m_acc.shape, -jnp.inf, m_acc.dtype)
        se_acc[...] = jnp.zeros(se_acc.shape, se_acc.dtype)
        sx_acc[...] = jnp.zeros(sx_acc.shape, sx_acc.dtype)
        pk_acc[...] = jnp.zeros(pk_acc.shape, pk_acc.dtype)

    x = x_ref[...].astype(jnp.float32)          # (TM, TC) f32 compute on every gen
    t = t_ref[...]                              # (TM, 1) int32 targets
    tm, tc = x.shape

    # global class index of every lane in this block, (1, TC) -> broadcasts vs t
    col = j * tc + jax.lax.broadcasted_iota(jnp.int32, (1, tc), 1)

    if mask_cols:                               # only when C % TC != 0
        valid = col < num_classes
        x_max_in = jnp.where(valid, x, -jnp.inf)
        x_sum_in = jnp.where(valid, x, 0.0)
    else:
        x_max_in = x
        x_sum_in = x

    # online logsumexp update
    m_prev = m_acc[...]
    m_new = jnp.maximum(m_prev, jnp.max(x_max_in, axis=-1, keepdims=True))
    se_acc[...] = (se_acc[...] * jnp.exp(m_prev - m_new)
                   + jnp.sum(jnp.exp(x_max_in - m_new), axis=-1, keepdims=True))
    m_acc[...] = m_new

    # running raw-logit sum (smoothing term) and the target logit (iota-mask gather)
    sx_acc[...] += jnp.sum(x_sum_in, axis=-1, keepdims=True)
    pk_acc[...] += jnp.sum(jnp.where(col == t, x, 0.0), axis=-1, keepdims=True)

    @pl.when(j == pl.num_programs(1) - 1)
    def _finalize():
        lse = m_acc[...] + jnp.log(se_acc[...])              # (TM, 1) logsumexp
        nll_ref[...] = lse - pk_acc[...]                     # -log_softmax[target]
        smooth_ref[...] = num_classes * lse - sx_acc[...]    # -sum_j log_softmax_j


@functools.partial(jax.jit,
                   static_argnames=("e", "reduction", "block_rows", "block_cols"))
def label_smoothing_cross_entropy(output, target, e=0.1, reduction="mean",
                                  block_rows=None, block_cols=None):
    n, c = output.shape
    in_itemsize = jnp.dtype(output.dtype).itemsize
    budget, vmem_limit = _vmem_budget_bytes()
    auto_tm, auto_tc = _choose_tiles(n, c, in_itemsize, budget)

    tm = auto_tm if block_rows is None else int(block_rows)
    tc = auto_tc if block_cols is None else int(block_cols)
    # sanitize (also for user overrides) so TPU tiling constraints always hold
    tm = n if tm >= n else max((tm // _SUBLANE) * _SUBLANE, _SUBLANE)
    tc = c if tc >= c else max(_round_up(tc, _LANE), _LANE)
    mask_cols = (c % tc) != 0

    t_col = target.reshape(n, 1).astype(jnp.int32)
    kernel = functools.partial(_lsce_kernel, num_classes=c, mask_cols=mask_cols)

    nll_col, smooth_col = pl.pallas_call(
        kernel,
        out_shape=(jax.ShapeDtypeStruct((n, 1), jnp.float32),
                   jax.ShapeDtypeStruct((n, 1), jnp.float32)),
        grid=(pl.cdiv(n, tm), pl.cdiv(c, tc)),
        in_specs=[
            pl.BlockSpec((tm, tc), lambda i, j: (i, j)),   # logits, native dtype
            pl.BlockSpec((tm, 1), lambda i, j: (i, 0)),    # targets
        ],
        out_specs=(
            pl.BlockSpec((tm, 1), lambda i, j: (i, 0)),
            pl.BlockSpec((tm, 1), lambda i, j: (i, 0)),
        ),
        scratch_shapes=[pltpu.VMEM((tm, 1), jnp.float32)] * 4,
        compiler_params=pltpu.CompilerParams(
            dimension_semantics=("parallel", "arbitrary"),
            vmem_limit_bytes=int(vmem_limit)),
    )(output, t_col)

    nll_rows = nll_col[:, 0]
    smooth_rows = smooth_col[:, 0]

    if reduction == "mean":
        nll, loss = jnp.mean(nll_rows), jnp.mean(smooth_rows)
    elif reduction == "sum":
        nll, loss = jnp.sum(nll_rows), jnp.sum(smooth_rows)
    else:  # 'none'
        nll, loss = nll_rows, smooth_rows

    return (1.0 - e) * nll + e * (loss / c)


def _reference(output, target, e=0.1, reduction="mean"):
    """Pure-JAX reference mirroring the PyTorch module exactly."""
    c = output.shape[-1]
    log_preds = jax.nn.log_softmax(output.astype(jnp.float32), axis=-1)
    loss_rows = -jnp.sum(log_preds, axis=-1)
    nll_rows = -jnp.take_along_axis(
        log_preds, target.astype(jnp.int32)[:, None], axis=-1)[:, 0]
    if reduction == "mean":
        loss, nll = jnp.mean(loss_rows), jnp.mean(nll_rows)
    elif reduction == "sum":
        loss, nll = jnp.sum(loss_rows), jnp.sum(nll_rows)
    else:
        loss, nll = loss_rows, nll_rows
    return (1.0 - e) * nll + e * (loss / c)


if __name__ == "__main__":
    key = jax.random.PRNGKey(0)
    k1, k2, k3, k4 = jax.random.split(key, 4)

    # case 1: small f32 logits, auto tiling, mean reduction (ragged row blocks)
    n1, c1 = 24, 32
    x1 = jax.random.normal(k1, (n1, c1), dtype=jnp.float32)
    t1 = jax.random.randint(k2, (n1,), 0, c1, dtype=jnp.int32)
    out1 = label_smoothing_cross_entropy(x1, t1, e=0.1, reduction="mean")
    jax.block_until_ready(out1)
    ref1 = _reference(x1, t1, e=0.1, reduction="mean")
    assert jnp.allclose(out1, ref1, rtol=1e-5, atol=1e-5), (out1, ref1)

    # case 2: bf16 logits, ragged batch and class count, forced small tiles so the
    # online-logsumexp class tiling + boundary masking paths are exercised.
    n2, c2 = 20, 300
    x2 = jax.random.normal(k3, (n2, c2), dtype=jnp.float32).astype(jnp.bfloat16)
    t2 = jax.random.randint(k4, (n2,), 0, c2, dtype=jnp.int32)
    out2 = label_smoothing_cross_entropy(x2, t2, e=0.1, reduction="sum",
                                         block_rows=8, block_cols=128)
    jax.block_until_ready(out2)
    ref2 = _reference(x2, t2, e=0.1, reduction="sum")
    assert jnp.allclose(out2, ref2, rtol=2e-3, atol=2e-3), (out2, ref2)

    # case 3: reduction='none'
    out3 = label_smoothing_cross_entropy(x1, t1, e=0.1, reduction="none")
    jax.block_until_ready(out3)
    ref3 = _reference(x1, t1, e=0.1, reduction="none")
    assert jnp.allclose(out3, ref3, rtol=1e-5, atol=1e-5)

    print("KERNEL_OK")
</pallas_src>

<mosaic_0001>
module attributes {stable_mosaic.version = 11 : i64} {
  func.func @_lsce_kernel(%arg0: i32, %arg1: i32, %arg2: memref<16x32xf32, #tpu.memory_space<vmem>>, %arg3: memref<16x1xi32, #tpu.memory_space<vmem>>, %arg4: memref<16x1xf32, #tpu.memory_space<vmem>>, %arg5: memref<16x1xf32, #tpu.memory_space<vmem>>, %arg6: memref<16x1xf32, #tpu.memory_space<vmem>>, %arg7: memref<16x1xf32, #tpu.memory_space<vmem>>, %arg8: memref<16x1xf32, #tpu.memory_space<vmem>>, %arg9: memref<16x1xf32, #tpu.memory_space<vmem>>) attributes {dimension_semantics = [#tpu.dimension_semantics<parallel>, #tpu.dimension_semantics<arbitrary>], iteration_bounds = array<i64: 2, 1>, scalar_prefetch = 0 : i64, scratch_operands = 4 : i64, tpu.core_type = #tpu.core_type<tc>, window_params = [{transform_indices = @transform_0, window_bounds = array<i64: 16, 32>}, {transform_indices = @transform_1, window_bounds = array<i64: 16, 1>}, {transform_indices = @transform_2, window_bounds = array<i64: 16, 1>}, {transform_indices = @transform_3, window_bounds = array<i64: 16, 1>}]} {
    %c0_i32 = arith.constant 0 : i32
    %0 = arith.cmpi eq, %arg1, %c0_i32 : i32
    %1 = arith.extui %0 : i1 to i32
    %c0_i32_0 = arith.constant 0 : i32
    %2 = arith.cmpi ne, %1, %c0_i32_0 : i32
    scf.if %2 {
      %cst_26 = arith.constant 0xFF800000 : f32
      %43 = vector.broadcast %cst_26 : f32 to vector<16x1xf32>
      %c0_27 = arith.constant 0 : index
      %c0_28 = arith.constant 0 : index
      %44 = vector.load %arg6[%c0_27, %c0_28] : memref<16x1xf32, #tpu.memory_space<vmem>>, vector<16x1xf32>
      tpu.vector_store %arg6[%c0_27, %c0_28], %43 {strides = array<i32>} : memref<16x1xf32, #tpu.memory_space<vmem>>, vector<16x1xf32>,
      %cst_29 = arith.constant 0.000000e+00 : f32
      %45 = vector.broadcast %cst_29 : f32 to vector<16x1xf32>
      %c0_30 = arith.constant 0 : index
      %c0_31 = arith.constant 0 : index
      %46 = vector.load %arg7[%c0_30, %c0_31] : memref<16x1xf32, #tpu.memory_space<vmem>>, vector<16x1xf32>
      tpu.vector_store %arg7[%c0_30, %c0_31], %45 {strides = array<i32>} : memref<16x1xf32, #tpu.memory_space<vmem>>, vector<16x1xf32>,
      %cst_32 = arith.constant 0.000000e+00 : f32
      %47 = vector.broadcast %cst_32 : f32 to vector<16x1xf32>
      %c0_33 = arith.constant 0 : index
      %c0_34 = arith.constant 0 : index
      %48 = vector.load %arg8[%c0_33, %c0_34] : memref<16x1xf32, #tpu.memory_space<vmem>>, vector<16x1xf32>
      tpu.vector_store %arg8[%c0_33, %c0_34], %47 {strides = array<i32>} : memref<16x1xf32, #tpu.memory_space<vmem>>, vector<16x1xf32>,
      %cst_35 = arith.constant 0.000000e+00 : f32
      %49 = vector.broadcast %cst_35 : f32 to vector<16x1xf32>
      %c0_36 = arith.constant 0 : index
      %c0_37 = arith.constant 0 : index
      %50 = vector.load %arg9[%c0_36, %c0_37] : memref<16x1xf32, #tpu.memory_space<vmem>>, vector<16x1xf32>
      tpu.vector_store %arg9[%c0_36, %c0_37], %49 {strides = array<i32>} : memref<16x1xf32, #tpu.memory_space<vmem>>, vector<16x1xf32>,
    } else {
    }
    %c0 = arith.constant 0 : index
    %c0_1 = arith.constant 0 : index
    %3 = vector.load %arg2[%c0, %c0_1] : memref<16x32xf32, #tpu.memory_space<vmem>>, vector<16x32xf32>
    %c0_2 = arith.constant 0 : index
    %c0_3 = arith.constant 0 : index
    %4 = vector.load %arg3[%c0_2, %c0_3] : memref<16x1xi32, #tpu.memory_space<vmem>>, vector<16x1xi32>
    %c32_i32 = arith.constant 32 : i32
    %5 = arith.muli %arg1, %c32_i32 : i32
    %6 = tpu.iota {dimensions = array<i32: 1>} : vector<1x32xi32>
    %7 = vector.broadcast %5 : i32 to vector<1x32xi32>
    %8 = arith.addi %7, %6 : vector<1x32xi32>
    %c0_4 = arith.constant 0 : index
    %c0_5 = arith.constant 0 : index
    %9 = vector.load %arg6[%c0_4, %c0_5] : memref<16x1xf32, #tpu.memory_space<vmem>>, vector<16x1xf32>
    %cst = arith.constant dense<0xFF800000> : vector<16xf32>
    %10 = vector.multi_reduction <maximumf>, %3, %cst [1] : vector<16x32xf32> to vector<16xf32>
    %11 = vector.shape_cast %10 : vector<16xf32> to vector<16x1xf32>
    %12 = arith.maximumf %9, %11 : vector<16x1xf32>
    %c0_6 = arith.constant 0 : index
    %c0_7 = arith.constant 0 : index
    %13 = vector.load %arg7[%c0_6, %c0_7] : memref<16x1xf32, #tpu.memory_space<vmem>>, vector<16x1xf32>
    %14 = arith.subf %9, %12 : vector<16x1xf32>
    %15 = math.exp %14 : vector<16x1xf32>
    %16 = arith.mulf %13, %15 : vector<16x1xf32>
    %17 = vector.broadcast %12 : vector<16x1xf32> to vector<16x32xf32>
    %18 = arith.subf %3, %17 : vector<16x32xf32>
    %19 = math.exp %18 : vector<16x32xf32>
    %cst_8 = arith.constant dense<0.000000e+00> : vector<16xf32>
    %20 = vector.multi_reduction <add>, %19, %cst_8 [1] : vector<16x32xf32> to vector<16xf32>
    %21 = vector.shape_cast %20 : vector<16xf32> to vector<16x1xf32>
    %22 = arith.addf %16, %21 : vector<16x1xf32>
    %c0_9 = arith.constant 0 : index
    %c0_10 = arith.constant 0 : index
    %23 = vector.load %arg7[%c0_9, %c0_10] : memref<16x1xf32, #tpu.memory_space<vmem>>, vector<16x1xf32>
    tpu.vector_store %arg7[%c0_9, %c0_10], %22 {strides = array<i32>} : memref<16x1xf32, #tpu.memory_space<vmem>>, vector<16x1xf32>,
    %c0_11 = arith.constant 0 : index
    %c0_12 = arith.constant 0 : index
    %24 = vector.load %arg6[%c0_11, %c0_12] : memref<16x1xf32, #tpu.memory_space<vmem>>, vector<16x1xf32>
    tpu.vector_store %arg6[%c0_11, %c0_12], %12 {strides = array<i32>} : memref<16x1xf32, #tpu.memory_space<vmem>>, vector<16x1xf32>,
    %c0_13 = arith.constant 0 : index
    %c0_14 = arith.constant 0 : index
    %25 = vector.load %arg8[%c0_13, %c0_14] : memref<16x1xf32, #tpu.memory_space<vmem>>, vector<16x1xf32>
    %cst_15 = arith.constant dense<0.000000e+00> : vector<16xf32>
    %26 = vector.multi_reduction <add>, %3, %cst_15 [1] : vector<16x32xf32> to vector<16xf32>
    %27 = vector.shape_cast %26 : vector<16xf32> to vector<16x1xf32>
    %28 = arith.addf %25, %27 : vector<16x1xf32>
    %c0_16 = arith.constant 0 : index
    %c0_17 = arith.constant 0 : index
    %29 = vector.load %arg8[%c0_16, %c0_17] : memref<16x1xf32, #tpu.memory_space<vmem>>, vector<16x1xf32>
    tpu.vector_store %arg8[%c0_16, %c0_17], %28 {strides = array<i32>} : memref<16x1xf32, #tpu.memory_space<vmem>>, vector<16x1xf32>,
    %c0_18 = arith.constant 0 : index
    %c0_19 = arith.constant 0 : index
    %30 = vector.load %arg9[%c0_18, %c0_19] : memref<16x1xf32, #tpu.memory_space<vmem>>, vector<16x1xf32>
    %31 = vector.broadcast %8 : vector<1x32xi32> to vector<16x32xi32>
    %32 = vector.broadcast %4 : vector<16x1xi32> to vector<16x32xi32>
    %33 = arith.cmpi eq, %31, %32 : vector<16x32xi32>
    %cst_20 = arith.constant 0.000000e+00 : f32
    %34 = vector.broadcast %cst_20 : f32 to vector<16x32xf32>
    %35 = arith.select %33, %3, %34 : vector<16x32xi1>, vector<16x32xf32>
    %cst_21 = arith.constant dense<0.000000e+00> : vector<16xf32>
    %36 = vector.multi_reduction <add>, %35, %cst_21 [1] : vector<16x32xf32> to vector<16xf32>
    %37 = vector.shape_cast %36 : vector<16xf32> to vector<16x1xf32>
    %38 = arith.addf %30, %37 : vector<16x1xf32>
    %c0_22 = arith.constant 0 : index
    %c0_23 = arith.constant 0 : index
    %39 = vector.load %arg9[%c0_22, %c0_23] : memref<16x1xf32, #tpu.memory_space<vmem>>, vector<16x1xf32>
    tpu.vector_store %arg9[%c0_22, %c0_23], %38 {strides = array<i32>} : memref<16x1xf32, #tpu.memory_space<vmem>>, vector<16x1xf32>,
    %c0_i32_24 = arith.constant 0 : i32
    %40 = arith.cmpi eq, %arg1, %c0_i32_24 : i32
    %41 = arith.extui %40 : i1 to i32
    %c0_i32_25 = arith.constant 0 : i32
    %42 = arith.cmpi ne, %41, %c0_i32_25 : i32
    scf.if %42 {
      %c0_26 = arith.constant 0 : index
      %c0_27 = arith.constant 0 : index
      %43 = vector.load %arg6[%c0_26, %c0_27] : memref<16x1xf32, #tpu.memory_space<vmem>>, vector<16x1xf32>
      %c0_28 = arith.constant 0 : index
      %c0_29 = arith.constant 0 : index
      %44 = vector.load %arg7[%c0_28, %c0_29] : memref<16x1xf32, #tpu.memory_space<vmem>>, vector<16x1xf32>
      %45 = math.log %44 : vector<16x1xf32>
      %46 = arith.addf %43, %45 : vector<16x1xf32>
      %c0_30 = arith.constant 0 : index
      %c0_31 = arith.constant 0 : index
      %47 = vector.load %arg9[%c0_30, %c0_31] : memref<16x1xf32, #tpu.memory_space<vmem>>, vector<16x1xf32>
      %48 = arith.subf %46, %47 : vector<16x1xf32>
      %c0_32 = arith.constant 0 : index
      %c0_33 = arith.constant 0 : index
      %49 = vector.load %arg4[%c0_32, %c0_33] : memref<16x1xf32, #tpu.memory_space<vmem>>, vector<16x1xf32>
      tpu.vector_store %arg4[%c0_32, %c0_33], %48 {strides = array<i32>} : memref<16x1xf32, #tpu.memory_space<vmem>>, vector<16x1xf32>,
      %cst_34 = arith.constant 3.200000e+01 : f32
      %50 = vector.broadcast %cst_34 : f32 to vector<16x1xf32>
      %51 = arith.mulf %50, %46 : vector<16x1xf32>
      %c0_35 = arith.constant 0 : index
      %c0_36 = arith.constant 0 : index
      %52 = vector.load %arg8[%c0_35, %c0_36] : memref<16x1xf32, #tpu.memory_space<vmem>>, vector<16x1xf32>
      %53 = arith.subf %51, %52 : vector<16x1xf32>
      %c0_37 = arith.constant 0 : index
      %c0_38 = arith.constant 0 : index
      %54 = vector.load %arg5[%c0_37, %c0_38] : memref<16x1xf32, #tpu.memory_space<vmem>>, vector<16x1xf32>
      tpu.vector_store %arg5[%c0_37, %c0_38], %53 {strides = array<i32>} : memref<16x1xf32, #tpu.memory_space<vmem>>, vector<16x1xf32>,
    } else {
    }
    return
  }
  func.func @transform_0(%arg0: i32, %arg1: i32) -> (i32, i32) {
    %c0_i32 = arith.constant 0 : i32
    return %arg0, %arg1 : i32, i32
  }
  func.func @transform_1(%arg0: i32, %arg1: i32) -> (i32, i32) {
    %c0_i32 = arith.constant 0 : i32
    %c0_i32_0 = arith.constant 0 : i32
    return %arg0, %c0_i32 : i32, i32
  }
  func.func @transform_2(%arg0: i32, %arg1: i32) -> (i32, i32) {
    %c0_i32 = arith.constant 0 : i32
    %c0_i32_0 = arith.constant 0 : i32
    return %arg0, %c0_i32 : i32, i32
  }
  func.func @transform_3(%arg0: i32, %arg1: i32) -> (i32, i32) {
    %c0_i32 = arith.constant 0 : i32
    %c0_i32_0 = arith.constant 0 : i32
    return %arg0, %c0_i32 : i32, i32
  }
}

</mosaic_0001>

<bundles_post_ra>
// kernel: label_smoothing_cross_entropy.1
= control target key start
LH: loop header
LB: loop body
LE: loop exit
PB: predicated region body
PF: predicated region fallthrough
CT: control target
= control target key end

     0   :  { %s1267_s12 = smov 0   ;;  %s1269_s13 = smov 0   ;;  %s1435_s0 = inlined_call_operand.vmem [shape: f32[24,32], index: 0, kind: input, shape index: {}]   ;;  %s1436_s1 = inlined_call_operand.vmem [shape: s32[24,1], index: 1, kind: input, shape index: {}]   ;;  %s1437_s2 = inlined_call_operand.vmem [shape: f32[24,1], index: 2, kind: output, shape index: {0}]   ;;  %s1438_s3 = inlined_call_operand.vmem [shape: f32[24,1], index: 3, kind: output, shape index: {1}]  }
   0x1   :  { %s1271_s14 = smov 0   ;;  %s1273_s15 = smov 0  }
   0x2   :  { %s1275_s16 = smov 0  }
   0x3 LB: > { %s842_s17 = sadd.s32 4294967295, %s1178_s16   ;;  %s26_s18 = sadd.s32 1, %s1174_s15  ;;  %s1178_s16 = sphi %s1275_s16, %s14_s16   ;;  %s1174_s15 = sphi %s1273_s15, %s1443_s15   ;;  %s1170_s14 = sphi %s1271_s14, %s1442_s14   ;;  %s1166_s13 = sphi %s1269_s13, %s1441_s13   ;;  %s1162_s12 = sphi %s1267_s12, %s1440_s12  }
   0x4   : > { %p28_p0 = scmp.ge.s32.totalorder %s26_s18, 2  ;;  %s87_s19 = sadd.s32 1, %s1166_s13 }
   0x5   : > { %p97_p1 = scmp.ne.s32.totalorder %s1166_s13, %s1162_s12  ;;  %p98_p2 = scmp.eq.s32.totalorder %s842_s17, 1 }
   0x6   : > { %s1445_s18 = smov (%p28_p0, %s26_s18), 0  ;;  %p846_p4 = scmp.ge.s32.totalorder %s1178_s16, 1 }
   0x7   : > { %p1299_p3 = por %p98_p2, %p97_p1  ;;  %s84_s21 = ssub.s32 %s1174_s15, %s1445_s18 }
   0x8   : > { %p185_p5 = scmp.lt.s32.totalorder %s1178_s16, 3  ;;  %p85_p6 = scmp.eq.s32.totalorder %s84_s21, 0 }
   0xa   : > { %p186_p7 = pnand %p846_p4, %p185_p5 }
   0xb   : > { %s1308_s22 = scalar_select %p85_p6, %s1166_s13, %s87_s19  }
   0xc   : > { %189 = sbr.rel (%p186_p7) target bundleno = 564 (0x234), region = 28  ;;  %s1311_s23 = sshll.u32 (!%p186_p7), %s1170_s14, 1 }
   0xd   : > { %p233_p8 = scmp.lt.s32.totalorder (!%p186_p7), %s1311_s23, 2  ;;  %s219_s5 = sand.u32 (!%p186_p7), 1, %s1162_s12  }
   0xe   : > { %s847_s6 = sshll.u32 (!%p186_p7), %s219_s5, 4 }
   0xf   : > { %s1346_s7 = scalar_lea.vmem (!%p186_p7), [#allocation6], %s847_s6   ;;  %s1350_s8 = scalar_lea.vmem (!%p186_p7), [#allocation7], %s847_s6  }
  0x11   : > { %vm273_vm0 = vcmask 7168   ;;  %v1244_v0 = vmov -inf   ;;  %s234_s24 = scalar_select %p233_p8, %s1311_s23, 2  ;;  %vm293_vm1 = vcmask 261120   ;;  %v1245_v5 = vmov 0  }
  0x12   : > { %274 = vst.msk [vmem:[#allocation2] sm:$0xff] %vm273_vm0, %v1244_v0  ;;  %275 = vst.msk [vmem:[#allocation2 + $0x8] sm:$0xff] %vm273_vm0, %v1244_v0  ;;  %1062 = vset.pattern.permute.xlu1 %v1245_v5  ;;  %1063 = vset.pattern.permute.xlu0 %v1245_v5  ;;  %v1246_v6 = vmov 0.0   ;;  %v287_v24 = vlaneseq  ;;  %s414_s9 = ssub.s32 (%p1299_p3), 3, %s1311_s23  ;;  %s885_s10 = sshll.u32 (%p1299_p3), %s1170_s14, 4 }
  0x13   : > { %s850_s25 = sshll.u32 %s234_s24, 3  ;;  %276 = vst.msk [vmem:[#allocation3] sm:$0xff] %vm273_vm0, %v1246_v6  ;;  %277 = vst.msk [vmem:[#allocation3 + $0x8] sm:$0xff] %vm273_vm0, %v1246_v6  ;;  %p415_p9 = scmp.lt.s32.totalorder (%p1299_p3), %s414_s9, 2 }
  0x14   : > { %s239_s28 = scalar_lea.vmem %s1435_s0, %s850_s25  ;;  %s253_s4 = scalar_lea.vmem %s1436_s1, %s850_s25  ;;  %278 = vst.msk [vmem:[#allocation4] sm:$0xff] %vm273_vm0, %v1246_v6  ;;  %279 = vst.msk [vmem:[#allocation4 + $0x8] sm:$0xff] %vm273_vm0, %v1246_v6  ;;  %v288_v28 = vand.u32 127, %v287_v24 }
  0x15   : > { %v282_v1 = vld [vmem:[%s239_s28] sm:$0xff]  ;;  %v283_v2 = vld [vmem:[%s239_s28 + $0x8] sm:$0xff]  ;;  %280 = vst.msk [vmem:[#allocation5] sm:$0xff] %vm273_vm0, %v1246_v6  ;;  %281 = vst.msk [vmem:[#allocation5 + $0x8] sm:$0xff] %vm273_vm0, %v1246_v6  ;;  %s1365_s17 = scalar_lea.vmem (%p1299_p3), %s1437_s2, %s885_s10  }
  0x16   : > { %v294_v3 = vsel %vm293_vm1, %v282_v1, -inf  ;;  %v297_v4 = vsel %vm293_vm1, %v283_v2, -inf  ;;  %v284_v7 = vld [vmem:[%s253_s4] sm:$0xff]  ;;  %v285_v16 = vld [vmem:[%s253_s4 + $0x8] sm:$0xff]  ;;  %v343_v17 = vsel %vm293_vm1, %v282_v1, 0.0  ;;  %v346_v31 = vsel %vm293_vm1, %v283_v2, 0.0 }
  0x17   : > { %295 = vmax.xlane.f32.xlu0 %v294_v3 }
  0x19   : > { %v291_v8 = vld [vmem:[#allocation2] sm:$0xff]  ;;  %v292_v11 = vld [vmem:[#allocation2 + $0x8] sm:$0xff] }
  0x1a   : > { %v302_v43 = vld [vmem:[#allocation3] sm:$0xff]  ;;  %v303_v47 = vld [vmem:[#allocation3 + $0x8] sm:$0xff] }
  0x1b   : > { %298 = vmax.xlane.f32.xlu0 %v297_v4  ;;  %v341_v37 = vld [vmem:[#allocation4] sm:$0xff]  ;;  %v342_v52 = vld [vmem:[#allocation4 + $0x8] sm:$0xff] }
  0x1c   : > { %v353_v56 = vld [vmem:[#allocation5] sm:$0xff]  ;;  %v354_v60 = vld [vmem:[#allocation5 + $0x8] sm:$0xff] }
  0x31   : > { %356 = vperm.xlu0 %1063, %v284_v7  }
  0x50   : > { %344 = vadd.xlane.f32.xlu0 %v343_v17 }
  0xa0   : > { %v296_v9 = vpop.xlane.xlu0 %295 }
  0xa1   : > { %v300_v10 = vmax.f32 %v291_v8, %v296_v9 }
  0xa3   : > { %v304_v12 = vsub.f32 %v291_v8, %v300_v10  ;;  %339 = vst.msk [vmem:[#allocation2] sm:$0xff] %vm273_vm0, %v300_v10  ;;  %314 = vperm.xlu1 %1062, %v300_v10  }
  0xa4   : > { %v299_v13 = vpop.xlane.xlu0 %298 }
  0xa5   : > { %v301_v14 = vmax.f32 %v292_v11, %v299_v13  ;;  %v306_v40 = vmul.f32 1.442695, %v304_v12 }
  0xa7   : > { %v305_v15 = vsub.f32 %v292_v11, %v301_v14  ;;  %340 = vst.msk [vmem:[#allocation2 + $0x8] sm:$0xff] %vm273_vm0, %v301_v14  ;;  %319 = vperm.xlu1 %1062, %v301_v14  }
  0xa9   : > { %v308_v41 = vmul.f32 1.442695, %v305_v15 }
  0xab   : > { %359 = vperm.xlu1 %1062, %v285_v16  }
  0xac   : > { %v357_v27 = vpop.permute.xlu0 %356 }
  0xad   : > { %vm361_vm2 = vcmp.eq.s32.totalorder %v288_v28, %v357_v27 }
  0xae   : > { %v363_v33 = vsel %vm361_vm2, %v282_v1, 0.0  ;;  %v379_v9 = vld [vmem:[#allocation2 + $0x8] sm:$0xff] }
  0xaf   : > { %v365_v34 = vsel %vm293_vm1, %v363_v33, 0.0 }
  0xd9   : > { %v345_v38 = vpop.xlane.xlu0 %344 }
  0xda   : > { %v349_v39 = vadd.f32 %v345_v38, %v341_v37 }
  0xdc   : > { %351 = vst.msk [vmem:[#allocation4] sm:$0xff] %vm273_vm0, %v349_v39 }
  0xe3   : > { %v396_v5 = vld [vmem:[#allocation4] sm:$0xff] }
 0x11e   : > { %v315_v18 = vpop.permute.xlu1 %314 }
 0x11f   : > { %v322_v19 = vsub.f32 %v282_v1, %v315_v18  ;;  %v378_v1 = vld [vmem:[#allocation2] sm:$0xff] }
 0x121   : > { %v324_v20 = vmul.f32 1.442695, %v322_v19 }
 0x122   : > { %v320_v21 = vpop.permute.xlu1 %319 }
 0x123   : > { %1064 = vpow2.f32 %v324_v20  ;;  %v323_v22 = vsub.f32 %v283_v2, %v320_v21 }
 0x125   : > { %v326_v23 = vmul.f32 1.442695, %v323_v22 }
 0x126   : > { %v360_v32 = vpop.permute.xlu1 %359 }
 0x127   : > { %1066 = vpow2.f32 %v326_v23  ;;  %vm362_vm3 = vcmp.eq.s32.totalorder %v288_v28, %v360_v32 }
 0x128   : > { %v364_v35 = vsel %vm362_vm3, %v283_v2, 0.0  ;;  %1068 = vpow2.f32 %v306_v40 }
 0x129   : > { %v368_v36 = vsel %vm293_vm1, %v364_v35, 0.0  ;;  %1070 = vpow2.f32 %v308_v41 }
 0x130   : > { %v1065_v25 = vpop.eup %1064 }
 0x131   : > { %v328_v26 = vsel %vm293_vm1, %v1065_v25, 0.0 }
 0x132   : > { %329 = vadd.xlane.f32.xlu1 %v328_v26 }
 0x134   : > { %v1067_v29 = vpop.eup %1066 }
 0x135   : > { %v331_v30 = vsel %vm293_vm1, %v1067_v29, 0.0  ;;  %v1069_v42 = vpop.eup %1068 }
 0x136   : > { %332 = vadd.xlane.f32.xlu1 %v331_v30  ;;  %v310_v44 = vmul.f32 %v1069_v42, %v302_v43  ;;  %v1071_v45 = vpop.eup %1070 }
 0x137   : > { %v311_v49 = vmul.f32 %v1071_v45, %v303_v47 }
 0x13a   : > { %347 = vadd.xlane.f32.xlu1 %v346_v31 }
 0x13e   : > { %366 = vadd.xlane.f32.xlu1 %v365_v34 }
 0x142   : > { %369 = vadd.xlane.f32.xlu1 %v368_v36 }
 0x1bb   : > { %v330_v46 = vpop.xlane.xlu1 %329 }
 0x1bc   : > { %v334_v48 = vadd.f32 %v330_v46, %v310_v44 }
 0x1be   : > { %337 = vst.msk [vmem:[#allocation3] sm:$0xff] %vm273_vm0, %v334_v48 }
 0x1bf   : > { %v333_v50 = vpop.xlane.xlu1 %332 }
 0x1c0   : > { %v335_v51 = vadd.f32 %v333_v50, %v311_v49 }
 0x1c2   : > { %338 = vst.msk [vmem:[#allocation3 + $0x8] sm:$0xff] %vm273_vm0, %v335_v51 }
 0x1c3   : > { %v348_v53 = vpop.xlane.xlu1 %347 }
 0x1c4   : > { %v350_v54 = vadd.f32 %v348_v53, %v342_v52 }
 0x1c5   : > { %v380_v55 = vld [vmem:[#allocation3] sm:$0xff] }
 0x1c6   : > { %1072 = vlog2.f32 %v380_v55  ;;  %352 = vst.msk [vmem:[#allocation4 + $0x8] sm:$0xff] %vm273_vm0, %v350_v54 }
 0x1c7   : > { %v367_v57 = vpop.xlane.xlu1 %366 }
 0x1c8   : > { %v371_v58 = vadd.f32 %v367_v57, %v353_v56 }
 0x1c9   : > { %v381_v59 = vld [vmem:[#allocation3 + $0x8] sm:$0xff] }
 0x1ca   : > { %1074 = vlog2.f32 %v381_v59  ;;  %373 = vst.msk [vmem:[#allocation5] sm:$0xff] %vm273_vm0, %v371_v58 }
 0x1cb   : > { %v370_v61 = vpop.xlane.xlu1 %369 }
 0x1cc   : > { %v372_v62 = vadd.f32 %v370_v61, %v354_v60 }
 0x1cd   : > { %v397_v15 = vld [vmem:[#allocation4 + $0x8] sm:$0xff] }
 0x1ce   : > { %374 = vst.msk [vmem:[#allocation5 + $0x8] sm:$0xff] %vm273_vm0, %v372_v62 }
 0x1d1   : > { %v388_v2 = vld [vmem:[#allocation5] sm:$0xff] }
 0x1d3   : > { %v1073_v63 = vpop.eup %1072 }
 0x1d4   : > { %v383_v0 = vmul.f32 0.6931472, %v1073_v63 }
 0x1d5   : > { %v389_v12 = vld [vmem:[#allocation5 + $0x8] sm:$0xff] }
 0x1d6   : > { %v386_v3 = vadd.f32 %v383_v0, %v378_v1 }
 0x1d7   : > { %v1075_v4 = vpop.eup %1074 }
 0x1d8   : > { %v385_v6 = vmul.f32 0.6931472, %v1075_v4  ;;  %v390_v7 = vsub.f32 %v386_v3, %v388_v2  ;;  %v394_v8 = vmul.f32 32.0, %v386_v3 }
 0x1da   : > { %v387_v10 = vadd.f32 %v385_v6, %v379_v9  ;;  %392 = vst.msk [vmem:[%s1346_s7] sm:$0xff] %vm273_vm0, %v390_v7  ;;  %v398_v11 = vsub.f32 %v394_v8, %v396_v5 }
 0x1dc   : > { %v395_v13 = vmul.f32 32.0, %v387_v10  ;;  %v391_v14 = vsub.f32 %v387_v10, %v389_v12  ;;  %400 = vst.msk [vmem:[%s1350_s8] sm:$0xff] %vm273_vm0, %v398_v11  ;;  %412 = sbr.rel (!%p1299_p3) target bundleno = 520 (0x208), region = 40 }
 0x1de   : > { %v399_v16 = vsub.f32 %v395_v13, %v397_v15  ;;  %393 = vst.msk [vmem:[%s1346_s7 + $0x8] sm:$0xff] %vm273_vm0, %v391_v14 }
 0x1e0   : > { %401 = vst.msk [vmem:[%s1350_s8 + $0x8] sm:$0xff] %vm273_vm0, %v399_v16 }
 0x1e1   : > { %s1447_s9 = smov (!%p415_p9, %s414_s9), 2 }
 0x1e2   : > { %s856_s19 = sshll.u32 %s1447_s9, 7 }
 0x1e3   : > { %p859_p10 = scmp.eq.s32.totalorder %s856_s19, 0 }
 0x1e4   : > { %s1371_s21 = sshrl.u32 (!%p859_p10), %s1447_s9, 1 }
 0x1e5   : > { %423 = sbr.rel (%p859_p10) target bundleno = 520 (0x208), region = 44  ;;  %p860_p11 = scmp.le.s32.totalorder (!%p859_p10), %s1371_s21, 0 }
 0x1ea   : > { %747 = sbr.rel (%p860_p11) target bundleno = 503 (0x1f7), region = 195  ;;  %s1180_s24 = smov (!%p860_p11), %s1365_s17  }
 0x1eb   : > { %s1184_s25 = smov (!%p860_p11), %s1346_s7   ;;  %s1188_s26 = smov (!%p860_p11), 0  }
 0x1ec   : > { %s1192_s27 = smov (!%p860_p11), 0  }
 0x1ef LB: >> { %v488_v17 = vld [vmem:[%s1186_s25] sm:$0xff]  ;;  %v490_v18 = vld [vmem:[%s1186_s25 + $0x8] sm:$0xff]  ;;  %s492_s28 = sadd.s32 1, %s1190_s26  ;;  %s482_s27 = sadd.s32 1, %s1194_s27   ;;  %s1194_s27 = sphi %s1192_s27, %s482_s27   ;;  %s1190_s26 = sphi %s1188_s26, %s1189_s26   ;;  %s1186_s25 = sphi %s1184_s25, %s497_s25   ;;  %s1182_s24 = sphi %s1180_s24, %s498_s24  }
 0x1f0   : >> { %489 = vst [vmem:[%s1182_s24] sm:$0xff] %v488_v17  ;;  %491 = vst [vmem:[%s1182_s24 + $0x8] sm:$0xff] %v490_v18  ;;  %p493_p12 = scmp.ge.s32.totalorder %s492_s28, %s1371_s21  ;;  %p481_p13 = scmp.ge.s32.totalorder %s482_s27, %s1371_s21 }
 0x1f2   : >> { %s1449_s28 = smov (%p493_p12, %s492_s28), 0  ;;  %484 = sbr.rel (!%p481_p13) target bundleno = 495 (0x1ef), region = 201 }
 0x1f3   : >> { %s861_s29 = sshll.u32 %s1449_s28, 4  ;;  %s1189_s26 = smov %s1449_s28  }
 0x1f4   : >> { %s497_s25 = scalar_lea.vmem %s1346_s7, %s861_s29 [#allocation6]   ;;  %s498_s24 = scalar_lea.vmem %s1365_s17, %s861_s29  }
 0x1f7 PF: > { %s1381_s30 = sand.u32 1, %s1447_s9   ;;  %s886_s4 = sshll.u32 %s1371_s21, 4 }
 0x1f8   : > { %s503_s5 = scalar_lea.vmem %s1346_s7, %s886_s4 [#allocation6]   ;;  %s505_s6 = scalar_lea.vmem %s1365_s17, %s886_s4  }
 0x1f9   : > { %p866_p0 = scmp.le.s32.totalorder %s1381_s30, 0 }
 0x1fa   : > { %s1196_s10 = smov (!%p866_p0), %s505_s6   ;;  %s1200_s11 = smov (!%p866_p0), %s503_s5  }
 0x1fb   : > { %761 = sbr.rel (%p866_p0) target bundleno = 520 (0x208), region = 206  ;;  %s1204_s12 = smov (!%p866_p0), 0  }
 0x1fc   : > { %s1208_s19 = smov (!%p866_p0), 0  }
 0x200 LB: >> { %v515_v19 = vld [vmem:[%s1202_s11] sm:$0xff]  ;;  %s517_s9 = sadd.s32 1, %s1206_s12  ;;  %s509_s19 = sadd.s32 1, %s1210_s19   ;;  %s1210_s19 = sphi %s1208_s19, %s509_s19   ;;  %s1206_s12 = sphi %s1204_s12, %s1205_s12   ;;  %s1202_s11 = sphi %s1200_s11, %s522_s11   ;;  %s1198_s10 = sphi %s1196_s10, %s523_s10  }
 0x201   : >> { %516 = vst [vmem:[%s1198_s10] sm:$0xff] %v515_v19  ;;  %p518_p1 = scmp.ge.s32.totalorder %s517_s9, %s1381_s30  ;;  %p508_p2 = scmp.ge.s32.totalorder %s509_s19, %s1381_s30 }
 0x203   : >> { %s1451_s9 = smov (%p518_p1, %s517_s9), 0  ;;  %511 = sbr.rel (!%p508_p2) target bundleno = 512 (0x200), region = 212 }
 0x204   : >> { %s867_s7 = sshll.u32 %s1451_s9, 3  ;;  %s1205_s12 = smov %s1451_s9  }
 0x205   : >> { %s522_s11 = scalar_lea.vmem %s503_s5, %s867_s7 [#allocation6]   ;;  %s523_s10 = scalar_lea.vmem %s505_s6, %s867_s7  }
 0x208 PF: > { %529 = sbr.rel (!%p1299_p3) target bundleno = 564 (0x234), region = 92  ;;  %s531_s17 = ssub.s32 (%p1299_p3), 3, %s1311_s23 }
 0x209   : > { %s888_s21 = sshll.u32 (%p1299_p3), %s1170_s14, 4  ;;  %p532_p4 = scmp.lt.s32.totalorder (%p1299_p3), %s531_s17, 2 }
 0x20a   : > { %s1396_s26 = scalar_lea.vmem (%p1299_p3), %s1438_s3, %s888_s21  }
 0x20d   : > { %s1453_s17 = smov (!%p532_p4, %s531_s17), 2 }
 0x20e   : > { %s870_s27 = sshll.u32 %s1453_s17, 7 }
 0x20f   : > { %p873_p5 = scmp.eq.s32.totalorder %s870_s27, 0 }
 0x210   : > { %s1402_s28 = sshrl.u32 (!%p873_p5), %s1453_s17, 1 }
 0x211   : > { %540 = sbr.rel (%p873_p5) target bundleno = 564 (0x234), region = 96  ;;  %p874_p3 = scmp.le.s32.totalorder (!%p873_p5), %s1402_s28, 0 }
 0x216   : > { %775 = sbr.rel (%p874_p3) target bundleno = 547 (0x223), region = 217  ;;  %s1212_s14 = smov (!%p874_p3), %s1396_s26  }
 0x217   : > { %s1216_s20 = smov (!%p874_p3), %s1350_s8   ;;  %s1220_s23 = smov (!%p874_p3), 0  }
 0x218   : > { %s1224_s29 = smov (!%p874_p3), 0  }
 0x21b LB: >> { %v605_v20 = vld [vmem:[%s1218_s20] sm:$0xff]  ;;  %v607_v21 = vld [vmem:[%s1218_s20 + $0x8] sm:$0xff]  ;;  %s609_s30 = sadd.s32 1, %s1222_s23  ;;  %s599_s29 = sadd.s32 1, %s1226_s29   ;;  %s1226_s29 = sphi %s1224_s29, %s599_s29   ;;  %s1222_s23 = sphi %s1220_s23, %s1221_s23   ;;  %s1218_s20 = sphi %s1216_s20, %s614_s20   ;;  %s1214_s14 = sphi %s1212_s14, %s615_s14  }
 0x21c   : >> { %606 = vst [vmem:[%s1214_s14] sm:$0xff] %v605_v20  ;;  %608 = vst [vmem:[%s1214_s14 + $0x8] sm:$0xff] %v607_v21  ;;  %p610_p6 = scmp.ge.s32.totalorder %s609_s30, %s1402_s28  ;;  %p598_p7 = scmp.ge.s32.totalorder %s599_s29, %s1402_s28 }
 0x21e   : >> { %s1455_s30 = smov (%p610_p6, %s609_s30), 0  ;;  %601 = sbr.rel (!%p598_p7) target bundleno = 539 (0x21b), region = 223 }
 0x21f   : >> { %s875_s4 = sshll.u32 %s1455_s30, 4  ;;  %s1221_s23 = smov %s1455_s30  }
 0x220   : >> { %s614_s20 = scalar_lea.vmem %s1350_s8, %s875_s4 [#allocation7]   ;;  %s615_s14 = scalar_lea.vmem %s1396_s26, %s875_s4  }
 0x223 PF: > { %s1412_s5 = sand.u32 1, %s1453_s17   ;;  %s889_s6 = sshll.u32 %s1402_s28, 4 }
 0x224   : > { %s620_s10 = scalar_lea.vmem %s1350_s8, %s889_s6 [#allocation7]   ;;  %s622_s11 = scalar_lea.vmem %s1396_s26, %s889_s6  }
 0x225   : > { %p880_p8 = scmp.le.s32.totalorder %s1412_s5, 0 }
 0x226   : > { %s1228_s12 = smov (!%p880_p8), %s622_s11   ;;  %s1232_s19 = smov (!%p880_p8), %s620_s10  }
 0x227   : > { %789 = sbr.rel (%p880_p8) target bundleno = 564 (0x234), region = 228  ;;  %s1236_s9 = smov (!%p880_p8), 0  }
 0x228   : > { %s1240_s7 = smov (!%p880_p8), 0  }
 0x22c LB: >> { %v632_v22 = vld [vmem:[%s1234_s19] sm:$0xff]  ;;  %s634_s17 = sadd.s32 1, %s1238_s9  ;;  %s626_s7 = sadd.s32 1, %s1242_s7   ;;  %s1242_s7 = sphi %s1240_s7, %s626_s7   ;;  %s1238_s9 = sphi %s1236_s9, %s1237_s9   ;;  %s1234_s19 = sphi %s1232_s19, %s639_s19   ;;  %s1230_s12 = sphi %s1228_s12, %s640_s12  }
 0x22d   : >> { %633 = vst [vmem:[%s1230_s12] sm:$0xff] %v632_v22  ;;  %p635_p9 = scmp.ge.s32.totalorder %s634_s17, %s1412_s5  ;;  %p625_p10 = scmp.ge.s32.totalorder %s626_s7, %s1412_s5 }
 0x22f   : >> { %s1457_s17 = smov (%p635_p9, %s634_s17), 0  ;;  %628 = sbr.rel (!%p625_p10) target bundleno = 556 (0x22c), region = 234 }
 0x230   : >> { %s881_s8 = sshll.u32 %s1457_s17, 3  ;;  %s1237_s9 = smov %s1457_s17  }
 0x231   : >> { %s639_s19 = scalar_lea.vmem %s620_s10, %s881_s8 [#allocation7]   ;;  %s640_s12 = scalar_lea.vmem %s622_s11, %s881_s8  }
 0x234 PF: > { %s14_s16 = sadd.s32 1, %s1178_s16   ;;  %s1440_s12 = smov %s1166_s13 }
 0x235   : > { %p11_p11 = scmp.ge.s32.totalorder %s14_s16, 4   ;;  %s1441_s13 = smov %s1308_s22 }
 0x236   : > { %s1442_s14 = smov %s1174_s15  ;;  %s1443_s15 = smov %s1445_s18 }
 0x237   :  { %13 = sbr.rel (!%p11_p11) target bundleno = 3 (0x3), region = 245 }

</bundles_post_ra>
